<compile_context>
chip_gen: v7x
topology: tpu7x:2x2x1
jax: 0.10.0
libtpu: 0.0.40
codegen_flags: <defaults>
</compile_context>

<pallas_src>
import functools

import jax
import jax.numpy as jnp
from jax.experimental import pallas as pl
from jax.experimental.pallas import tpu as pltpu


def _round_up(x, m):
    return ((x + m - 1) // m) * m


def _pick_tile(dim, align, cap):
    """Pick (tile, padded_dim) with tile a multiple of `align`, tile <= cap
    (for multi-block dims), tile dividing padded_dim, and padding waste bounded
    by num_blocks * align (never tile-1)."""
    dim_al = _round_up(dim, align)
    if dim_al <= cap:
        return dim_al, dim_al
    nb = -(-dim_al // cap)                       # number of blocks
    tile = _round_up(-(-dim_al // nb), align)    # even split, re-aligned
    return tile, tile * nb


def _pad2(a, rows, cols):
    pr, pc = rows - a.shape[0], cols - a.shape[1]
    if pr == 0 and pc == 0:
        return a
    return jnp.pad(a, ((0, pr), (0, pc)))


def _linear_bias_kernel(w_ref, x_ref, b_ref, o_ref):
    """One (tm, tn) tile of Y = W @ X + b.

    The f32 output block is the accumulator (its block index is constant across
    the k axis, so it stays resident in VMEM).  It is initialized with the
    broadcast bias at k == 0; every k step adds one MXU partial product.
    """
    @pl.when(pl.program_id(2) == 0)
    def _():
        o_ref[...] = jnp.broadcast_to(b_ref[...], o_ref.shape)

    o_ref[...] += jnp.dot(
        w_ref[...], x_ref[...], preferred_element_type=jnp.float32
    )


def make_vanilla_rnn_linear(
    weight,
    bias,
    *,
    compute_dtype=jnp.bfloat16,   # MXU streaming dtype; accumulation is always f32
    tm_cap=256,
    tn_cap=512,
    tk_cap=1024,
):
    """One-time weight/bias preparation (pad + cast). Returns apply(x) -> Y.

    weight: (O, I) f32, bias: (O, 1) f32.  apply(x) with x: (I, N) f32 returns
    Y = weight @ x + bias as (O, N) f32.
    """
    O, I = weight.shape
    assert bias.shape == (O, 1), "bias must be (out_features, 1)"

    tm, O_pad = _pick_tile(O, 8, tm_cap)      # sublane-aligned output rows
    tk, I_pad = _pick_tile(I, 128, tk_cap)    # lane-aligned reduction dim

    # Hoisted, one-time work: padded + casted weight, padded f32 bias.
    w_p = _pad2(weight, O_pad, I_pad).astype(compute_dtype)
    b_p = _pad2(bias, O_pad, 1).astype(jnp.float32)
    dsz = jnp.dtype(compute_dtype).itemsize

    def apply(x):
        I2, N = x.shape
        assert I2 == I, "in_features mismatch"

        tn, N_pad = _pick_tile(N, 128, tn_cap)
        x_p = _pad2(x, I_pad, N_pad).astype(compute_dtype)

        # Megacore (v7x): if N collapsed to one block and O is a single block,
        # halve tm (when still 8-aligned and dividing O_pad) so the 'parallel'
        # i axis has >= 2 blocks and the second TensorCore gets work.
        tm_eff = tm
        if N_pad // tn == 1 and O_pad // tm == 1 and tm % 16 == 0:
            tm_eff = tm // 2

        nb_i = O_pad // tm_eff
        nb_j = N_pad // tn
        nb_k = I_pad // tk
        grid = (nb_i, nb_j, nb_k)

        # VMEM budget from the actual double-buffered footprint (+margin),
        # capped at 40 MiB so it is safe on v7x's 64 MiB physical VMEM
        # (v5e/v6e have 128 MiB and are trivially fine).
        footprint = (
            2 * (tm_eff * tk + tk * tn) * dsz   # double-buffered W, X tiles
            + 2 * tm_eff * 128 * 4              # bias tile (lane-padded), x2
            + 2 * tm_eff * tn * 4               # resident output + writeback
        )
        vmem_limit = int(min(40 * 2**20, max(2 * footprint, 16 * 2**20)))

        # Bytes including re-reads: W streamed once per j block, X once per i
        # block, output written once, bias read once per j block.
        flops = 2 * O_pad * I_pad * N_pad
        bytes_accessed = (
            O_pad * I_pad * dsz * nb_j
            + I_pad * N_pad * dsz * nb_i
            + O_pad * N_pad * 4
            + O_pad * 4 * nb_j
        )

        y_pad = pl.pallas_call(
            _linear_bias_kernel,
            out_shape=jax.ShapeDtypeStruct((O_pad, N_pad), jnp.float32),
            grid_spec=pltpu.PrefetchScalarGridSpec(
                num_scalar_prefetch=0,
                grid=grid,
                in_specs=[
                    pl.BlockSpec((tm_eff, tk), lambda i, j, k: (i, k)),  # W
                    pl.BlockSpec((tk, tn), lambda i, j, k: (k, j)),      # X
                    pl.BlockSpec((tm_eff, 1), lambda i, j, k: (i, 0)),   # bias
                ],
                out_specs=pl.BlockSpec((tm_eff, tn), lambda i, j, k: (i, j)),
            ),
            compiler_params=pltpu.CompilerParams(
                dimension_semantics=("parallel", "parallel", "arbitrary"),
                vmem_limit_bytes=vmem_limit,
            ),
            cost_estimate=pl.CostEstimate(
                flops=flops, transcendentals=0, bytes_accessed=bytes_accessed
            ),
        )(w_p, x_p, b_p)

        return y_pad[:O, :N]

    return apply


def vanilla_rnn_linear(weight, x, bias, **kwargs):
    """One-shot convenience wrapper (prefer the factory inside an RNN loop)."""
    return make_vanilla_rnn_linear(weight, bias, **kwargs)(x)


if __name__ == "__main__":
    # Module config (deterministic init mimicking the PyTorch uniform(-0.2, 0.2)).
    in_features = 32
    out_features = 16
    n_cols = 8  # number of column vectors in the input batch

    key = jax.random.PRNGKey(0)
    kw, kb, kx, kx2 = jax.random.split(key, 4)
    weight = jax.random.uniform(
        kw, (out_features, in_features), jnp.float32, minval=-0.2, maxval=0.2)
    bias = jax.random.uniform(
        kb, (out_features, 1), jnp.float32, minval=-0.2, maxval=0.2)
    x = jax.random.normal(kx, (in_features, n_cols), jnp.float32)
    x2 = jax.random.normal(kx2, (in_features, n_cols), jnp.float32)

    # Prepare weight/bias once (padding + bf16 cast hoisted out of the step),
    # then apply per "timestep".
    linear = make_vanilla_rnn_linear(weight, bias)
    linear_jit = jax.jit(linear)

    y = jax.block_until_ready(linear_jit(x))
    y2 = jax.block_until_ready(linear_jit(x2))

    # Reference with matching bf16 input rounding (kernel accumulates in f32).
    def ref_bf16(w, v, b):
        wf = w.astype(jnp.bfloat16).astype(jnp.float32)
        vf = v.astype(jnp.bfloat16).astype(jnp.float32)
        return wf @ vf + b

    assert y.shape == (out_features, n_cols)
    assert jnp.allclose(y, ref_bf16(weight, x, bias), atol=1e-4, rtol=1e-4)
    assert jnp.allclose(y2, ref_bf16(weight, x2, bias), atol=1e-4, rtol=1e-4)
    # Sanity vs the full-f32 PyTorch-equivalent reference (loose tol for bf16).
    assert jnp.allclose(y, weight @ x + bias, atol=2e-2)
    assert jnp.allclose(y2, weight @ x2 + bias, atol=2e-2)

    # Optional full-precision path (exact f32 parity with the PyTorch module).
    y32 = jax.block_until_ready(
        vanilla_rnn_linear(weight, x, bias, compute_dtype=jnp.float32))
    assert jnp.allclose(y32, weight @ x + bias, atol=1e-5, rtol=1e-5)

    print("KERNEL_OK")
</pallas_src>

<mosaic_0001>
module attributes {stable_mosaic.version = 11 : i64} {
  func.func @_linear_bias_kernel(%arg0: i32, %arg1: i32, %arg2: i32, %arg3: memref<8x128xbf16, #tpu.memory_space<vmem>>, %arg4: memref<128x128xbf16, #tpu.memory_space<vmem>>, %arg5: memref<8x1xf32, #tpu.memory_space<vmem>>, %arg6: memref<8x128xf32, #tpu.memory_space<vmem>>) attributes {dimension_semantics = [#tpu.dimension_semantics<parallel>, #tpu.dimension_semantics<parallel>, #tpu.dimension_semantics<arbitrary>], iteration_bounds = array<i64: 2, 1, 1>, scalar_prefetch = 0 : i64, scratch_operands = 0 : i64, tpu.core_type = #tpu.core_type<tc>, window_params = [{transform_indices = @transform_0, window_bounds = array<i64: 8, 128>}, {transform_indices = @transform_1, window_bounds = array<i64: 128, 128>}, {transform_indices = @transform_2, window_bounds = array<i64: 8, 1>}, {transform_indices = @transform_3, window_bounds = array<i64: 8, 128>}]} {
    %c0_i32 = arith.constant 0 : i32
    %0 = arith.cmpi eq, %arg2, %c0_i32 : i32
    %1 = arith.extui %0 : i1 to i32
    %c0_i32_0 = arith.constant 0 : i32
    %2 = arith.cmpi ne, %1, %c0_i32_0 : i32
    scf.if %2 {
      %c0_8 = arith.constant 0 : index
      %c0_9 = arith.constant 0 : index
      %9 = vector.load %arg5[%c0_8, %c0_9] : memref<8x1xf32, #tpu.memory_space<vmem>>, vector<8x1xf32>
      %10 = vector.shape_cast %9 : vector<8x1xf32> to vector<8x1xf32>
      %11 = vector.broadcast %10 : vector<8x1xf32> to vector<8x128xf32>
      %c0_10 = arith.constant 0 : index
      %c0_11 = arith.constant 0 : index
      %12 = vector.load %arg6[%c0_10, %c0_11] : memref<8x128xf32, #tpu.memory_space<vmem>>, vector<8x128xf32>
      tpu.vector_store %arg6[%c0_10, %c0_11], %11 {strides = array<i32>} : memref<8x128xf32, #tpu.memory_space<vmem>>, vector<8x128xf32>,
    } else {
    }
    %c0 = arith.constant 0 : index
    %c0_1 = arith.constant 0 : index
    %3 = vector.load %arg6[%c0, %c0_1] : memref<8x128xf32, #tpu.memory_space<vmem>>, vector<8x128xf32>
    %c0_2 = arith.constant 0 : index
    %c0_3 = arith.constant 0 : index
    %4 = vector.load %arg3[%c0_2, %c0_3] : memref<8x128xbf16, #tpu.memory_space<vmem>>, vector<8x128xbf16>
    %c0_4 = arith.constant 0 : index
    %c0_5 = arith.constant 0 : index
    %5 = vector.load %arg4[%c0_4, %c0_5] : memref<128x128xbf16, #tpu.memory_space<vmem>>, vector<128x128xbf16>
    %cst = arith.constant dense<0.000000e+00> : vector<8x128xf32>
    %6 = tpu.matmul %4, %5, %cst {dimension_numbers = #tpu.dot_dimension_numbers<[1], [0], [0], [1], [0, 0, 1, 1], [], []>} : vector<8x128xbf16>, vector<128x128xbf16>, vector<8x128xf32> -> vector<8x128xf32>
    %7 = arith.addf %3, %6 : vector<8x128xf32>
    %c0_6 = arith.constant 0 : index
    %c0_7 = arith.constant 0 : index
    %8 = vector.load %arg6[%c0_6, %c0_7] : memref<8x128xf32, #tpu.memory_space<vmem>>, vector<8x128xf32>
    tpu.vector_store %arg6[%c0_6, %c0_7], %7 {strides = array<i32>} : memref<8x128xf32, #tpu.memory_space<vmem>>, vector<8x128xf32>,
    return
  }
  func.func @transform_0(%arg0: i32, %arg1: i32, %arg2: i32) -> (i32, i32) {
    %c0_i32 = arith.constant 0 : i32
    return %arg0, %arg2 : i32, i32
  }
  func.func @transform_1(%arg0: i32, %arg1: i32, %arg2: i32) -> (i32, i32) {
    %c0_i32 = arith.constant 0 : i32
    return %arg2, %arg1 : i32, i32
  }
  func.func @transform_2(%arg0: i32, %arg1: i32, %arg2: i32) -> (i32, i32) {
    %c0_i32 = arith.constant 0 : i32
    %c0_i32_0 = arith.constant 0 : i32
    return %arg0, %c0_i32 : i32, i32
  }
  func.func @transform_3(%arg0: i32, %arg1: i32, %arg2: i32) -> (i32, i32) {
    %c0_i32 = arith.constant 0 : i32
    return %arg0, %arg1 : i32, i32
  }
}

</mosaic_0001>

<bundles_post_ra>
// kernel: apply.1
= control target key start
LH: loop header
LB: loop body
LE: loop exit
PB: predicated region body
PF: predicated region fallthrough
CT: control target
= control target key end

     0   :  { %s613_s12 = smov 0   ;;  %s615_s13 = smov 0   ;;  %s677_s0 = inlined_call_operand.vmem [shape: bf16[16,128], index: 0, kind: input, shape index: {}]   ;;  %s678_s1 = inlined_call_operand.vmem [shape: bf16[128,128], index: 1, kind: input, shape index: {}]   ;;  %s679_s2 = inlined_call_operand.vmem [shape: f32[16,1], index: 2, kind: input, shape index: {}]   ;;  %s680_s3 = inlined_call_operand.vmem [shape: f32[16,128], index: 3, kind: output, shape index: {}]  }
   0x1   :  { %s617_s14 = smov 0  }
   0x2 LB: > { %s32_s15 = sadd.s32 1, %s584_s13  ;;  %p487_p0 = scmp.ge.s32.totalorder %s588_s14, 1  ;;  %s588_s14 = sphi %s617_s14, %s13_s14   ;;  %s584_s13 = sphi %s615_s13, %s682_s13   ;;  %s580_s12 = sphi %s613_s12, %s681_s12  }
   0x3   : > { %p34_p1 = scmp.ge.s32.totalorder %s32_s15, 2  ;;  %p187_p2 = scmp.lt.s32.totalorder %s588_s14, 3 }
   0x5   : > { %s684_s15 = smov (%p34_p1, %s32_s15), 0  ;;  %p188_p3 = pnand %p487_p0, %p187_p2 }
   0x6   : > { %v558_v0 = vld [vmem:[%s678_s1] sm:$0xff] (!%p188_p3)   ;;  %v590_v1 = vmov (!%p188_p3), 0.0   ;;  %v559_v2 = vld [vmem:[%s678_s1 + $0x8] sm:$0xff] (!%p188_p3)   ;;  %vm591_vm0 = vmmov (!%p188_p3), 0   ;;  %p227_p4 = scmp.lt.s32.totalorder (!%p188_p3), %s580_s12, 1  ;;  %v592_v3 = vmov (!%p188_p3), 0  }
   0x7   : > { %191 = sbr.rel (%p188_p3) target bundleno = 254 (0xfe), region = 32  ;;  %510 = vmatprep.subr.bf16.mxu0 (!%p188_p3), %v590_v1  ;;  %526 = vmatprep.mubr.msk.bf16.mxu0 (!%p188_p3), %vm591_vm0, %v590_v1  ;;  %v560_v4 = vld [vmem:[%s678_s1 + $0x10] sm:$0xff] (!%p188_p3)   ;;  %v561_v6 = vld [vmem:[%s678_s1 + $0x18] sm:$0xff] (!%p188_p3)   ;;  %v562_v7 = vld [vmem:[%s678_s1 + $0x20] sm:$0xff] (!%p188_p3)  }
   0x8   : > { %511 = vmatpush3.bf16.msra.mxu0 (!%p188_p3), %v558_v0  ;;  %557 = vset.pattern.permute.xlu0 (!%p188_p3), %v592_v3  ;;  %v563_v8 = vld [vmem:[%s678_s1 + $0x28] sm:$0xff] (!%p188_p3)   ;;  %v564_v9 = vld [vmem:[%s678_s1 + $0x30] sm:$0xff] (!%p188_p3)   ;;  %v565_v10 = vld [vmem:[%s678_s1 + $0x38] sm:$0xff] (!%p188_p3)  }
   0x9   : > { %512 = vmatprep.subr.bf16.mxu0 (!%p188_p3), %v590_v1 }
   0xc   : > { %513 = vmatpush3.bf16.msra.mxu0 (!%p188_p3), %v559_v2 }
   0xd   : > { %514 = vmatprep.subr.bf16.mxu0 (!%p188_p3), %v590_v1 }
   0xe   : > { %s686_s12 = smov (!%p227_p4, %s580_s12), 1 }
   0xf   : > { %s489_s22 = sshll.u32 %s686_s12, 3  ;;  %s488_s7 = sshll.u32 %s686_s12, 2 }
  0x10   : > { %s246_s25 = scalar_lea.vmem %s679_s2, %s489_s22  ;;  %515 = vmatpush3.bf16.msra.mxu0 %v560_v4  ;;  %s233_s16 = scalar_lea.vmem %s677_s0, %s488_s7 }
  0x11   : > { %v259_v5 = vld [vmem:[%s246_s25] sm:$0xff]  ;;  %516 = vmatprep.subr.bf16.mxu0 %v590_v1  ;;  %s253_s19 = scalar_lea.vmem %s680_s3, %s489_s22 }
  0x12   : > { %262 = vperm.xlu0 %557, %v259_v5   ;;  %v267_v11 = vld [vmem:[%s233_s16] sm:$0xf] }
  0x14   : > { %517 = vmatpush3.bf16.msra.mxu0 %v561_v6 }
  0x15   : > { %518 = vmatprep.subr.bf16.mxu0 %v590_v1 }
  0x18   : > { %519 = vmatpush3.bf16.msra.mxu0 %v562_v7 }
  0x19   : > { %520 = vmatprep.subr.bf16.mxu0 %v590_v1 }
  0x1c   : > { %521 = vmatpush3.bf16.msra.mxu0 %v563_v8 }
  0x1d   : > { %522 = vmatprep.subr.bf16.mxu0 %v590_v1 }
  0x20   : > { %523 = vmatpush3.bf16.msra.mxu0 %v564_v9 }
  0x21   : > { %524 = vmatprep.subr.bf16.mxu0 %v590_v1 }
  0x24   : > { %525 = vmatpush3.bf16.msra.mxu0 %v565_v10 }
  0x27   : > { %527 = vmatmul.mubr.bf16.vlgmr.msra.gmra.mrb[0].mxu0 %v267_v11 }
  0x91   : > { %v263_v12 = vpop.permute.xlu0 %262 }
  0xfa   : > { %v366_v13 = vpop.f32.mrb[0].mxu0 }
  0xfb   : > { %v372_v14 = vadd.f32 %v366_v13, %v263_v12  ;;  %v528_v15 = vpop.f32.mrb[1].mxu0 }
  0xfc   : > { %v369_v16 = vpop.f32.mrb[2].mxu0 }
  0xfd   : > { %373 = vst [vmem:[%s253_s19] sm:$0xff] %v372_v14  ;;  %v529_v17 = vpop.f32.mrb[3].mxu0 }
  0xfe PF: > { %s13_s14 = sadd.s32 1, %s588_s14   ;;  %s681_s12 = smov %s584_s13 }
  0xff   : > { %p10_p5 = scmp.ge.s32.totalorder %s13_s14, 4   ;;  %s682_s13 = smov %s684_s15 }
 0x101   :  { %12 = sbr.rel (!%p10_p5) target bundleno = 2 (0x2), region = 72 }

</bundles_post_ra>
